<compile_context>
chip_gen: v6e
topology: v6e:2x2x1
jax: 0.10.0
libtpu: 0.0.40
codegen_flags: <defaults>
</compile_context>

<pallas_src>
import functools

import jax
import jax.numpy as jnp
from jax.experimental import pallas as pl
from jax.experimental.pallas import tpu as pltpu


# ------------------------------ tile selection -------------------------------

def _round_up(x, m):
    return ((x + m - 1) // m) * m


def _pick_tile_v(V, block_v, max_tile_v=2048):
    """Vocab tile: multiple of 128 that divides V (or the full V)."""
    if block_v is not None:
        block_v = min(int(block_v), V)
        assert V % block_v == 0, "block_v must divide the vocab size"
        return block_v
    if V <= max_tile_v or V % 128 != 0:
        return V
    for cand in range(max_tile_v, 127, -128):
        if V % cand == 0:
            return cand
    return V


def _pick_tile_m(M, D, V, tile_v, out_itemsize, mxu_itemsize, budget_bytes):
    """Largest aligned row tile fitting the VMEM budget."""
    align = 256 if M >= 256 else 8
    # Bytes that scale with tile_m: x tile (double-buffered, MXU dtype),
    # full-vocab output slab (double-buffered), m/l scratch.
    per_row = 2 * D * mxu_itemsize + 2 * V * out_itemsize + 2 * 4
    # Fixed: double-buffered weight + bias vocab chunks.
    fixed = 2 * D * tile_v * mxu_itemsize + 2 * tile_v * 4
    avail = budget_bytes - fixed
    tile_m = max(align, avail // max(per_row, 1))
    tile_m = max(align, (tile_m // align) * align)
    tile_m = min(tile_m, 1024)
    tile_m = min(tile_m, max(_round_up(M, align), align))
    return int(tile_m)


# ------------------------------ Pallas kernel --------------------------------

def _generator_kernel(x_ref, w_ref, b_ref, o_ref, m_ref, l_ref, *, tile_v):
    # x: (tile_m, D) bf16   w: (D, tile_v) bf16   b: (1, tile_v) f32
    # o: (tile_m, V)        m/l scratch: (tile_m, 1) f32, resident over vocab axis
    j = pl.program_id(1)
    nv = pl.num_programs(1)

    @pl.when(j == 0)
    def _():
        m_ref[...] = jnp.full_like(m_ref, -jnp.inf)
        l_ref[...] = jnp.zeros_like(l_ref)

    # MXU matmul for this vocab chunk; f32 accumulation / epilogue.
    logits = jnp.dot(x_ref[...], w_ref[...], preferred_element_type=jnp.float32)
    logits = logits + b_ref[...].astype(jnp.float32)

    # Online max / sum-exp update.
    m_prev = m_ref[...]
    m_new = jnp.maximum(m_prev, jnp.max(logits, axis=-1, keepdims=True))
    l_ref[...] = (jnp.exp(m_prev - m_new) * l_ref[...]
                  + jnp.sum(jnp.exp(logits - m_new), axis=-1, keepdims=True))
    m_ref[...] = m_new

    # Stash raw logits straight into the output slab (no extra f32 temporaries).
    col = pl.multiple_of(j * tile_v, tile_v)
    o_ref[:, pl.ds(col, tile_v)] = logits.astype(o_ref.dtype)

    # Final vocab step: normalize the whole slab in place.
    @pl.when(j == nv - 1)
    def _():
        norm = m_ref[...] + jnp.log(l_ref[...])          # (tile_m, 1) logsumexp
        o_ref[...] = (o_ref[...].astype(jnp.float32) - norm).astype(o_ref.dtype)


# ------------------------------ Python wrapper -------------------------------

@functools.partial(
    jax.jit,
    static_argnames=("block_m", "block_v", "out_dtype", "mxu_dtype",
                     "vmem_limit_bytes"))
def generator_forward(x, w, b, *, block_m=None, block_v=None,
                      out_dtype=jnp.float32, mxu_dtype=jnp.bfloat16,
                      vmem_limit_bytes=64 * 1024 * 1024):
    """x: (..., D), w: (D, V), b: (V,) -> log_softmax(x @ w + b, axis=-1)."""
    D = x.shape[-1]
    V = w.shape[1]
    lead = x.shape[:-1]

    # One-time casts in the wrapper (not re-executed per grid step in-kernel).
    x2d = x.reshape(-1, D).astype(mxu_dtype)
    w_c = w.astype(mxu_dtype)
    b2d = b.reshape(1, V).astype(jnp.float32)
    M = x2d.shape[0]

    out_itemsize = jnp.dtype(out_dtype).itemsize
    mxu_itemsize = jnp.dtype(mxu_dtype).itemsize

    tile_v = _pick_tile_v(V, block_v)
    if block_m is not None:
        tile_m = min(int(block_m), M)
    else:
        tile_m = _pick_tile_m(M, D, V, tile_v, out_itemsize, mxu_itemsize,
                              budget_bytes=(vmem_limit_bytes * 3) // 4)
    if tile_m < M:
        tile_m = min(_round_up(tile_m, 8), M)   # (8, 128) sublane rule

    grid = (pl.cdiv(M, tile_m), V // tile_v)    # no padding: partial last row
                                                # tile's stores are masked

    out = pl.pallas_call(
        functools.partial(_generator_kernel, tile_v=tile_v),
        out_shape=jax.ShapeDtypeStruct((M, V), out_dtype),
        grid_spec=pltpu.PrefetchScalarGridSpec(
            num_scalar_prefetch=0,
            grid=grid,
            in_specs=[
                pl.BlockSpec((tile_m, D), lambda i, j: (i, 0)),  # row tile of x
                pl.BlockSpec((D, tile_v), lambda i, j: (0, j)),  # weight chunk
                pl.BlockSpec((1, tile_v), lambda i, j: (0, j)),  # bias chunk
            ],
            out_specs=pl.BlockSpec((tile_m, V), lambda i, j: (i, 0)),
            scratch_shapes=[
                pltpu.VMEM((tile_m, 1), jnp.float32),   # running max
                pltpu.VMEM((tile_m, 1), jnp.float32),   # running sum-exp
            ]),
        compiler_params=pltpu.CompilerParams(
            dimension_semantics=("parallel", "arbitrary"),
            vmem_limit_bytes=vmem_limit_bytes),
    )(x2d, w_c, b2d)

    return out.reshape(*lead, V)


# ------------------------------- pure-JAX ref ---------------------------------

def ref_generator(x, w, b):
    logits = x @ w + b
    return jax.nn.log_softmax(logits, axis=-1)


# ----------------------------------- main -------------------------------------

if __name__ == "__main__":
    key = jax.random.PRNGKey(0)
    keys = jax.random.split(key, 6)

    def run_case(B, S, D, V, block_m, block_v, ks):
        k_x, k_w, k_b = ks
        x = jax.random.normal(k_x, (B, S, D), jnp.float32)
        w = 0.1 * jax.random.normal(k_w, (D, V), jnp.float32)
        b = 0.1 * jax.random.normal(k_b, (V,), jnp.float32)

        out = generator_forward(x, w, b, block_m=block_m, block_v=block_v)
        out = jax.block_until_ready(out)

        ref = ref_generator(x, w, b)
        assert out.shape == (B, S, V), out.shape
        err = float(jnp.max(jnp.abs(out.astype(jnp.float32) - ref)))
        assert err < 3e-2, f"max abs err {err}"       # bf16 MXU vs f32 reference
        row_sum_err = float(jnp.max(jnp.abs(
            jnp.sum(jnp.exp(out.astype(jnp.float32)), axis=-1) - 1.0)))
        assert row_sum_err < 1e-3, f"row sum err {row_sum_err}"

    # Case 1: toy Generator shapes; block_m=8 -> 2 parallel row tiles
    # (so both v7x TensorCores get work even at this size), single vocab tile.
    run_case(2, 8, 32, 128, 8, None, keys[:3])

    # Case 2: exercises the V-tiled online log-softmax path (2 vocab tiles,
    # running max/lse over the "arbitrary" vocab axis).
    run_case(2, 8, 128, 256, 8, 128, keys[3:])

    print("KERNEL_OK")
</pallas_src>

<mosaic_0001>
module attributes {stable_mosaic.version = 11 : i64} {
  func.func @_generator_kernel(%arg0: i32, %arg1: i32, %arg2: memref<8x32xbf16, #tpu.memory_space<vmem>>, %arg3: memref<32x128xbf16, #tpu.memory_space<vmem>>, %arg4: memref<1x128xf32, #tpu.memory_space<vmem>>, %arg5: memref<8x128xf32, #tpu.memory_space<vmem>>, %arg6: memref<8x1xf32, #tpu.memory_space<vmem>>, %arg7: memref<8x1xf32, #tpu.memory_space<vmem>>) attributes {dimension_semantics = [#tpu.dimension_semantics<parallel>, #tpu.dimension_semantics<arbitrary>], iteration_bounds = array<i64: 2, 1>, scalar_prefetch = 0 : i64, scratch_operands = 2 : i64, tpu.core_type = #tpu.core_type<tc>, window_params = [{transform_indices = @transform_0, window_bounds = array<i64: 8, 32>}, {transform_indices = @transform_1, window_bounds = array<i64: 32, 128>}, {transform_indices = @transform_2, window_bounds = array<i64: 1, 128>}, {transform_indices = @transform_3, window_bounds = array<i64: 8, 128>}]} {
    %c0_i32 = arith.constant 0 : i32
    %0 = arith.cmpi eq, %arg1, %c0_i32 : i32
    %1 = arith.extui %0 : i1 to i32
    %c0_i32_0 = arith.constant 0 : i32
    %2 = arith.cmpi ne, %1, %c0_i32_0 : i32
    scf.if %2 {
      %cst_19 = arith.constant 0xFF800000 : f32
      %32 = vector.broadcast %cst_19 : f32 to vector<8x1xf32>
      %c0_20 = arith.constant 0 : index
      %c0_21 = arith.constant 0 : index
      %33 = vector.load %arg6[%c0_20, %c0_21] : memref<8x1xf32, #tpu.memory_space<vmem>>, vector<8x1xf32>
      tpu.vector_store %arg6[%c0_20, %c0_21], %32 {strides = array<i32>} : memref<8x1xf32, #tpu.memory_space<vmem>>, vector<8x1xf32>,
      %cst_22 = arith.constant 0.000000e+00 : f32
      %34 = vector.broadcast %cst_22 : f32 to vector<8x1xf32>
      %c0_23 = arith.constant 0 : index
      %c0_24 = arith.constant 0 : index
      %35 = vector.load %arg7[%c0_23, %c0_24] : memref<8x1xf32, #tpu.memory_space<vmem>>, vector<8x1xf32>
      tpu.vector_store %arg7[%c0_23, %c0_24], %34 {strides = array<i32>} : memref<8x1xf32, #tpu.memory_space<vmem>>, vector<8x1xf32>,
    } else {
    }
    %c0 = arith.constant 0 : index
    %c0_1 = arith.constant 0 : index
    %3 = vector.load %arg2[%c0, %c0_1] : memref<8x32xbf16, #tpu.memory_space<vmem>>, vector<8x32xbf16>
    %c0_2 = arith.constant 0 : index
    %c0_3 = arith.constant 0 : index
    %4 = vector.load %arg3[%c0_2, %c0_3] : memref<32x128xbf16, #tpu.memory_space<vmem>>, vector<32x128xbf16>
    %cst = arith.constant dense<0.000000e+00> : vector<8x128xf32>
    %5 = tpu.matmul %3, %4, %cst {dimension_numbers = #tpu.dot_dimension_numbers<[1], [0], [0], [1], [0, 0, 1, 1], [], []>} : vector<8x32xbf16>, vector<32x128xbf16>, vector<8x128xf32> -> vector<8x128xf32>
    %c0_4 = arith.constant 0 : index
    %c0_5 = arith.constant 0 : index
    %6 = vector.load %arg4[%c0_4, %c0_5] : memref<1x128xf32, #tpu.memory_space<vmem>>, vector<1x128xf32>
    %7 = vector.broadcast %6 : vector<1x128xf32> to vector<8x128xf32>
    %8 = arith.addf %5, %7 : vector<8x128xf32>
    %c0_6 = arith.constant 0 : index
    %c0_7 = arith.constant 0 : index
    %9 = vector.load %arg6[%c0_6, %c0_7] : memref<8x1xf32, #tpu.memory_space<vmem>>, vector<8x1xf32>
    %cst_8 = arith.constant dense<0xFF800000> : vector<8xf32>
    %10 = vector.multi_reduction <maximumf>, %8, %cst_8 [1] : vector<8x128xf32> to vector<8xf32>
    %11 = vector.shape_cast %10 : vector<8xf32> to vector<8x1xf32>
    %12 = arith.maximumf %9, %11 : vector<8x1xf32>
    %13 = arith.subf %9, %12 : vector<8x1xf32>
    %14 = math.exp %13 : vector<8x1xf32>
    %c0_9 = arith.constant 0 : index
    %c0_10 = arith.constant 0 : index
    %15 = vector.load %arg7[%c0_9, %c0_10] : memref<8x1xf32, #tpu.memory_space<vmem>>, vector<8x1xf32>
    %16 = arith.mulf %14, %15 : vector<8x1xf32>
    %17 = vector.broadcast %12 : vector<8x1xf32> to vector<8x128xf32>
    %18 = arith.subf %8, %17 : vector<8x128xf32>
    %19 = math.exp %18 : vector<8x128xf32>
    %cst_11 = arith.constant dense<0.000000e+00> : vector<8xf32>
    %20 = vector.multi_reduction <add>, %19, %cst_11 [1] : vector<8x128xf32> to vector<8xf32>
    %21 = vector.shape_cast %20 : vector<8xf32> to vector<8x1xf32>
    %22 = arith.addf %16, %21 : vector<8x1xf32>
    %c0_12 = arith.constant 0 : index
    %c0_13 = arith.constant 0 : index
    %23 = vector.load %arg7[%c0_12, %c0_13] : memref<8x1xf32, #tpu.memory_space<vmem>>, vector<8x1xf32>
    tpu.vector_store %arg7[%c0_12, %c0_13], %22 {strides = array<i32>} : memref<8x1xf32, #tpu.memory_space<vmem>>, vector<8x1xf32>,
    %c0_14 = arith.constant 0 : index
    %c0_15 = arith.constant 0 : index
    %24 = vector.load %arg6[%c0_14, %c0_15] : memref<8x1xf32, #tpu.memory_space<vmem>>, vector<8x1xf32>
    tpu.vector_store %arg6[%c0_14, %c0_15], %12 {strides = array<i32>} : memref<8x1xf32, #tpu.memory_space<vmem>>, vector<8x1xf32>,
    %c128_i32 = arith.constant 128 : i32
    %25 = arith.muli %arg1, %c128_i32 : i32
    %26 = tpu.assume_multiple %25, 128 : i32
    %c0_16 = arith.constant 0 : index
    %27 = arith.index_cast %26 : i32 to index
    %28 = vector.load %arg5[%c0_16, %27] : memref<8x128xf32, #tpu.memory_space<vmem>>, vector<8x128xf32>
    tpu.vector_store %arg5[%c0_16, %27], %8 {strides = array<i32>} : memref<8x128xf32, #tpu.memory_space<vmem>>, vector<8x128xf32>,
    %c0_i32_17 = arith.constant 0 : i32
    %29 = arith.cmpi eq, %arg1, %c0_i32_17 : i32
    %30 = arith.extui %29 : i1 to i32
    %c0_i32_18 = arith.constant 0 : i32
    %31 = arith.cmpi ne, %30, %c0_i32_18 : i32
    scf.if %31 {
      %c0_19 = arith.constant 0 : index
      %c0_20 = arith.constant 0 : index
      %32 = vector.load %arg6[%c0_19, %c0_20] : memref<8x1xf32, #tpu.memory_space<vmem>>, vector<8x1xf32>
      %c0_21 = arith.constant 0 : index
      %c0_22 = arith.constant 0 : index
      %33 = vector.load %arg7[%c0_21, %c0_22] : memref<8x1xf32, #tpu.memory_space<vmem>>, vector<8x1xf32>
      %34 = math.log %33 : vector<8x1xf32>
      %35 = arith.addf %32, %34 : vector<8x1xf32>
      %c0_23 = arith.constant 0 : index
      %c0_24 = arith.constant 0 : index
      %36 = vector.load %arg5[%c0_23, %c0_24] : memref<8x128xf32, #tpu.memory_space<vmem>>, vector<8x128xf32>
      %37 = vector.broadcast %35 : vector<8x1xf32> to vector<8x128xf32>
      %38 = arith.subf %36, %37 : vector<8x128xf32>
      %c0_25 = arith.constant 0 : index
      %c0_26 = arith.constant 0 : index
      %39 = vector.load %arg5[%c0_25, %c0_26] : memref<8x128xf32, #tpu.memory_space<vmem>>, vector<8x128xf32>
      tpu.vector_store %arg5[%c0_25, %c0_26], %38 {strides = array<i32>} : memref<8x128xf32, #tpu.memory_space<vmem>>, vector<8x128xf32>,
    } else {
    }
    return
  }
  func.func @transform_0(%arg0: i32, %arg1: i32) -> (i32, i32) {
    %c0_i32 = arith.constant 0 : i32
    %c0_i32_0 = arith.constant 0 : i32
    return %arg0, %c0_i32 : i32, i32
  }
  func.func @transform_1(%arg0: i32, %arg1: i32) -> (i32, i32) {
    %c0_i32 = arith.constant 0 : i32
    %c0_i32_0 = arith.constant 0 : i32
    return %c0_i32, %arg1 : i32, i32
  }
  func.func @transform_2(%arg0: i32, %arg1: i32) -> (i32, i32) {
    %c0_i32 = arith.constant 0 : i32
    %c0_i32_0 = arith.constant 0 : i32
    return %c0_i32, %arg1 : i32, i32
  }
  func.func @transform_3(%arg0: i32, %arg1: i32) -> (i32, i32) {
    %c0_i32 = arith.constant 0 : i32
    %c0_i32_0 = arith.constant 0 : i32
    return %arg0, %c0_i32 : i32, i32
  }
}

</mosaic_0001>

<bundles_post_ra>
// kernel: generator_forward.1
= control target key start
LH: loop header
LB: loop body
LE: loop exit
PB: predicated region body
PF: predicated region fallthrough
CT: control target
= control target key end

     0   :  { %8 = vsyncpa [#allocation5], 0  ;;  %s750_s0 = inlined_call_operand.vmem [shape: bf16[16,32], index: 0, kind: input, shape index: {}]   ;;  %s751_s1 = inlined_call_operand.vmem [shape: bf16[32,128], index: 1, kind: input, shape index: {}]   ;;  %s752_s2 = inlined_call_operand.vmem [shape: f32[1,128], index: 2, kind: input, shape index: {}]   ;;  %s753_s3 = inlined_call_operand.hbm [shape: f32[16,128], index: 3, kind: output, shape index: {}]  }
   0x1   :  { %10 = vsyncpa [#allocation5 + $0x1], 0  ;;  %s638_s12 = smov 0   ;;  %s640_s13 = smov 0  }
   0x2   :  { %s642_s14 = smov 0   ;;  %s644_s15 = smov 0  }
   0x3   :  { %s646_s16 = smov 0   ;;  %s648_s17 = smov 0  }
   0x4 LB: > { %s438_s18 = sadd.s32 4294967295, %s611_s17   ;;  %s439_s19 = sadd.s32 4294967294, %s611_s17   ;;  %s611_s17 = sphi %s648_s17, %s16_s17   ;;  %s607_s16 = sphi %s646_s16, %s760_s16   ;;  %s603_s15 = sphi %s644_s15, %s759_s15   ;;  %s599_s14 = sphi %s642_s14, %s758_s14   ;;  %s595_s13 = sphi %s640_s13, %s757_s13   ;;  %s591_s12 = sphi %s638_s12, %s756_s12  }
   0x5   : > { %s28_s20 = sadd.s32 1, %s607_s16  ;;  %s113_s21 = sadd.s32 1, %s599_s14 }
   0x6   : > { %p30_p0 = scmp.ge.s32.totalorder %s28_s20, 2  ;;  %p123_p1 = scmp.ne.s32.totalorder %s599_s14, %s595_s13 }
   0x7   : > { %p124_p2 = scmp.eq.s32.totalorder %s438_s18, 1  ;;  %p129_p3 = scmp.ne.s32.totalorder %s595_s13, %s591_s12 }
   0x8   : > { %s762_s20 = smov (%p30_p0, %s28_s20), 0  ;;  %p130_p5 = scmp.eq.s32.totalorder %s439_s19, 1 }
   0x9   : > { %p678_p4 = por %p124_p2, %p123_p1  ;;  %s110_s23 = ssub.s32 %s607_s16, %s762_s20 }
   0xa   : > { %p444_p6 = scmp.ge.s32.totalorder %s611_s17, 1  ;;  %p111_p7 = scmp.eq.s32.totalorder %s110_s23, 0 }
   0xb   : > { %p685_p8 = por %p130_p5, %p129_p3  ;;  %p168_p9 = scmp.lt.s32.totalorder %s611_s17, 3 }
   0xc   : > { %s691_s25 = scalar_select %p111_p7, %s599_s14, %s113_s21  }
   0xd   : > { %p169_p10 = pnand %p444_p6, %p168_p9 }
   0xe   : > { %p198_p11 = scmp.lt.s32.totalorder (!%p169_p10), %s603_s15, 1  ;;  %s195_s10 = sand.u32 (!%p169_p10), 1, %s595_s13  }
   0xf   : > { %172 = sbr.rel (%p169_p10) target bundleno = 811 (0x32b), region = 32  ;;  %s445_s11 = sshll.u32 (!%p169_p10), %s195_s10, 3 }
  0x10   : > { %s452_s18 = sshll.u32 (!%p169_p10), %s603_s15, 7  ;;  %s197_s19 = scalar_lea.vmem (!%p169_p10), [#allocation4], %s445_s11 }
  0x11   : > { %s343_s21 = sshll.u32 (!%p169_p10), %s197_s19, 4  ;;  %s341_s27 = scalar_lea.hbm (!%p169_p10), %s753_s3, %s452_s18  ;;  %s344_s21 = int_to_ptr.vmem [resolvable:$true] %s343_s21 }
  0x12   : > { %s330_s28 = scalar_lea.sflag (!%p169_p10), [#allocation5], %s195_s10  ;;  %s535_s29 = scalar_lea.vmem (!%p169_p10), %s344_s21, 128 }
  0x13   : > { %p536_p12 = scmp.ne.s32.totalorder (!%p169_p10), %s344_s21, %s535_s29 }
  0x14   : > { %vm214_vm0 = vcmask 7168   ;;  %v613_v0 = vmov 0.0   ;;  %v527_v1 = vld [vmem:[%s751_s1 + $0x8] sm:$0xff]   ;;  %vm614_vm1 = vmmov 0   ;;  %v528_v2 = vld [vmem:[%s751_s1] sm:$0xff]   ;;  %s199_s30 = scalar_select %p198_p11, %s603_s15, 1 }
  0x15   : > { %216 = vst.msk [vmem:[#allocation3] sm:$0xff] %vm214_vm0, %v613_v0  ;;  %458 = vmatprep.subr.bf16.mxu0 %v613_v0  ;;  %462 = vmatprep.mubr.msk.bf16.mxu0 %vm614_vm1, %v613_v0  ;;  %vm241_vm2 = vcmask 261120   ;;  %v615_v4 = vmov -inf   ;;  %v447_v5 = vld [vmem:[%s752_s2] ss:$0 sm:$0xff]  ;;  %v616_v11 = vmov 0   ;;  %p537_p13 = pnand %p536_p12, %p678_p4 }
  0x16   : > { %459 = vmatpush3.bf16.msra.mxu0 %v527_v1  ;;  %s446_s4 = sshll.u32 %s199_s30, 2  ;;  %215 = vst.msk [vmem:[#allocation2] sm:$0xff] %vm214_vm0, %v615_v4  ;;  %525 = vset.pattern.permute.xlu0 %v616_v11  ;;  %s617_s30 = smov [#allocation4]  }
  0x17   : > { %460 = vmatprep.subr.bf16.mxu0 %v613_v0  ;;  %s201_s7 = scalar_lea.vmem %s750_s0, %s446_s4  ;;  %526 = vset.pattern.permute.xlu1 %v616_v11  ;;  %p538_p0 = pneg %p537_p13 }
  0x18   : > { %v217_v3 = vld [vmem:[%s201_s7] sm:$0xf]  ;;  %s539_s4 = sshll.u32 %s617_s30, 4  ;;  %s540_s4 = int_to_ptr.vmem [resolvable:$false] %s539_s4 }
  0x19   : > { %s541_s15 = scalar_lea.vmem %s540_s4, 256  ;;  %p542_p1 = scmp.lt.s32.totalorder %s344_s21, %s540_s4 }
  0x1a   : > { %461 = vmatpush3.bf16.msra.mxu0 %v528_v2  ;;  %p543_p2 = scmp.lt.s32.totalorder %s541_s15, %s535_s29 }
  0x1c   : > { %v292_v22 = vld [vmem:[#allocation3] sm:$0xff]  ;;  %p544_p3 = por %p543_p2, %p542_p1 }
  0x1d   : > { %463 = vmatmul.mubr.msk.bf16.vlgmr.msra.gmra.mxu0 %vm241_vm2, %v217_v3  ;;  %v285_v12 = vld [vmem:[#allocation2] sm:$0xff] }
  0x1e   : > { %p545_p5 = pnand %p544_p3, %p538_p0 }
  0xdd   : > { %v279_v6 = vpop.f32.mrf.mxu0 }
  0xde   : > { %v280_v7 = vadd.f32 %v447_v5, %v279_v6 }
  0xdf   : > { %v464_v8 = vpop.f32.mrf.mxu0 }
  0xe0   : > { %286 = vmax.xlane.f32.xlu0 %v280_v7 }
  0xe1   : > { %v282_v9 = vpop.f32.mrf.mxu0 }
  0xe3   : > { %v465_v10 = vpop.f32.mrf.mxu0 }
 0x169   : > { %v287_v13 = vpop.xlane.xlu0 %286 }
 0x16a   : > { %v288_v14 = vmax.f32 %v285_v12, %v287_v13 }
 0x16c   : > { %v289_v15 = vsub.f32 %v285_v12, %v288_v14  ;;  %307 = vst.msk [vmem:[#allocation2] sm:$0xff] %vm214_vm0, %v288_v14  ;;  %296 = vperm.xlu0 %525, %v288_v14  }
 0x16e   : > { %v290_v20 = vmul.f32 1.442695, %v289_v15 }
 0x173   : > { %v316_v29 = vld [vmem:[#allocation2] sm:$0xff] }
 0x1e7   : > { %v297_v16 = vpop.permute.xlu0 %296 }
 0x1e8   : > { %v299_v17 = vsub.f32 %v280_v7, %v297_v16 }
 0x1ea   : > { %v300_v18 = vmul.f32 1.442695, %v299_v17 }
 0x1ec   : > { %529 = vpow2.f32 %v300_v18 }
 0x1ed   : > { %531 = vpow2.f32 %v290_v20 }
 0x1f9   : > { %v530_v19 = vpop.eup %529 }
 0x1fa   : > { %302 = vadd.xlane.f32.xlu1 %v530_v19  ;;  %v532_v21 = vpop.eup %531 }
 0x1fb   : > { %v293_v23 = vmul.f32 %v532_v21, %v292_v22 }
 0x283   : > { %v303_v24 = vpop.xlane.xlu1 %302 }
 0x284   : > { %v304_v25 = vadd.f32 %v303_v24, %v293_v23 }
 0x286   : > { %306 = vst.msk [vmem:[#allocation3] sm:$0xff] %vm214_vm0, %v304_v25 }
 0x28d   : > { %v317_v26 = vld [vmem:[#allocation3] sm:$0xff] }
 0x28e   : > { %533 = vlog2.f32 %v317_v26 }
 0x29b   : > { %v534_v27 = vpop.eup %533 }
 0x29c   : > { %v319_v28 = vmul.f32 0.6931472, %v534_v27 }
 0x29e   : > { %v320_v30 = vadd.f32 %v319_v28, %v316_v29 }
 0x2a0   : > { %324 = vperm.xlu1 %526, %v320_v30  }
 0x31b   : > { %v325_v31 = vpop.permute.xlu1 %324 }
 0x31c   : > { %v327_v32 = vsub.f32 %v280_v7, %v325_v31 }
 0x31e   : > { %328 = vst [vmem:[%s197_s19] sm:$0xff] %v327_v32 }
 0x31f   : > { %548 = shalt.err (!%p545_p5)
}
 0x320   : > { %s549_s5 = scalar_lea.hbm %s341_s27, 128  ;;  %s553_s8 = scalar_lea.hbm %s753_s3, 256 }
 0x321   : > { %p550_p6 = scmp.ne.s32.totalorder %s341_s27, %s549_s5  ;;  %p554_p10 = scmp.lt.s32.totalorder %s341_s27, %s753_s3 }
 0x322   : > { %p555_p11 = scmp.lt.s32.totalorder %s553_s8, %s549_s5 }
 0x323   : > { %p551_p7 = pnand %p550_p6, %p678_p4 }
 0x324   : > { %p556_p12 = por %p555_p11, %p554_p10 }
 0x325   : > { %p552_p9 = pneg %p551_p7 }
 0x327   : > { %p557_p13 = pnand %p556_p12, %p552_p9 }
 0x329   : > { %560 = shalt.err (!%p557_p13)
}
 0x32a   : > { %466 = dma.vmem_to_hbm [thread:$0]  (%p678_p4), %s344_s21, 128, %s341_s27, %s330_s28  }
 0x32b PF: > { %p472_p0 = scmp.ge.s32.totalorder %s611_s17, 2  ;;  %s355_s11 = sand.u32 1, %s591_s12  }
 0x32c   : > { %s356_s18 = scalar_lea.sflag [#allocation5], %s355_s11 }
 0x32d   : > { %p469_p1 = pnand %p472_p0, %p685_p8 }
 0x32f   : > { %p470_p2 = pneg %p469_p1 }
 0x331   : > { %586 = dma.done.wait (%p470_p2), %s356_s18, 128  }
 0x332   : > { %588 = vsyncadd (%p470_p2), %s356_s18, 4294967168  ;;  %s16_s17 = sadd.s32 1, %s611_s17   ;;  %s756_s12 = smov %s595_s13 }
 0x333   : > { %p13_p3 = scmp.ge.s32.totalorder %s16_s17, 4   ;;  %s757_s13 = smov %s599_s14 }
 0x334   : > { %s758_s14 = smov %s691_s25  ;;  %s759_s15 = smov %s607_s16 }
 0x335   : > { %s760_s16 = smov %s762_s20  ;;  %15 = sbr.rel (!%p13_p3) target bundleno = 4 (0x4), region = 82 }
 0x33a   :  { %361 = vsyncpa [#allocation5], 1 }
 0x33b   :  { %363 = vsyncpa [#allocation5 + $0x1], 1 }

</bundles_post_ra>
